<compile_context>
chip_gen: v5e
topology: v5e:2x2
jax: 0.10.0
libtpu: 0.0.40
codegen_flags: <defaults>
</compile_context>

<pallas_src>
import functools

import jax
import jax.numpy as jnp
from jax.experimental import pallas as pl
from jax.experimental.pallas import tpu as pltpu


def _accuracy_counts_kernel(yp_ref, yt_ref, counts_ref, *, padh, padw):
    # yp_ref block:     (1, C, H, W)   logits, native dtype
    # yt_ref block:     (1, C, Ht, Wt) targets, native dtype (cropped in-kernel)
    # counts_ref block: (2, C) float32 resident accumulator;
    #                   row 0 = per-class intersection counts,
    #                   row 1 = per-class positive counts.
    _, C, H, W = yp_ref.shape

    @pl.when(pl.program_id(0) == 0)
    def _init():
        counts_ref[...] = jnp.zeros_like(counts_ref)

    # Per-class planes (tiny; C is small and static, loops fully unrolled).
    yp = [yp_ref[0, c] for c in range(C)]                                # C x (H, W)
    yt = [yt_ref[0, c, pl.ds(padh, H), pl.ds(padw, W)] for c in range(C)]  # crop

    # Running max over the class axis.  softmax is strictly monotone per
    # pixel, so argmax(softmax(x)) == argmax(x); no exp needed.
    m = yp[0]
    for c in range(1, C):
        m = jnp.maximum(m, yp[c])

    # First-occurrence argmax mask per class (matches torch/jnp tie-breaking),
    # intersected with (y_true[:, c] == 1).
    seen = jnp.zeros((H, W), dtype=jnp.bool_)
    inter_rows = []
    pos_rows = []
    for c in range(C):
        eq_c = yp[c] == m
        hit_c = jnp.logical_and(eq_c, jnp.logical_not(seen))   # prediction == c
        seen = jnp.logical_or(seen, eq_c)
        pos_c = yt[c] == 1                                     # y_true[:, c] == 1
        inter_rows.append(jnp.logical_and(hit_c, pos_c).astype(jnp.float32))
        pos_rows.append(pos_c.astype(jnp.float32))

    inter = jnp.stack(inter_rows, axis=0)                      # (C, H, W)
    pos = jnp.stack(pos_rows, axis=0)                          # (C, H, W)

    num_row = jnp.sum(jnp.sum(inter, axis=-1), axis=-1)        # (C,)
    den_row = jnp.sum(jnp.sum(pos, axis=-1), axis=-1)          # (C,)

    # Accumulate into the VMEM-resident output block (single HBM writeback).
    counts_ref[0, :] += num_row
    counts_ref[1, :] += den_row


def _crop_offsets(pred_shape, true_shape):
    # Matches the PyTorch centercrop guard: only crop when BOTH pads > 0.
    _, _, h, w = pred_shape
    _, _, ht, wt = true_shape
    padw, padh = (wt - w) // 2, (ht - h) // 2
    if padw > 0 and padh > 0:
        return padh, padw
    return 0, 0


@functools.partial(jax.jit, static_argnames=("bback_ignore",))
def accuracy(y_pred, y_true, bback_ignore=True):
    n, ch, h, w = y_pred.shape
    nt, ct, ht, wt = y_true.shape
    padh, padw = _crop_offsets(y_pred.shape, y_true.shape)

    kernel = functools.partial(_accuracy_counts_kernel, padh=padh, padw=padw)

    # Advisory cost: purely memory-bound metric kernel.
    bytes_accessed = int(
        y_pred.size * y_pred.dtype.itemsize
        + y_true.size * y_true.dtype.itemsize
        + 2 * ch * 4
    )
    cost = pl.CostEstimate(
        flops=int(10 * n * ch * h * w),
        transcendentals=0,
        bytes_accessed=bytes_accessed,
    )

    counts = pl.pallas_call(
        kernel,
        out_shape=jax.ShapeDtypeStruct((2, ch), jnp.float32),
        grid=(n,),
        in_specs=[
            # Full 4-D blocks: last two dims equal the full array dims, so
            # they are legal lane/sublane dims regardless of alignment.
            pl.BlockSpec((1, ch, h, w), lambda i: (i, 0, 0, 0)),
            pl.BlockSpec((1, ct, ht, wt), lambda i: (i, 0, 0, 0)),
        ],
        # Counts accumulate across the batch axis -> constant block index,
        # one HBM writeback at the end of the grid.
        out_specs=pl.BlockSpec((2, ch), lambda i: (0, 0)),
        compiler_params=pltpu.CompilerParams(
            # The batch axis carries the resident accumulator -> "arbitrary".
            dimension_semantics=("arbitrary",),
        ),
        cost_estimate=cost,
    )(y_pred, y_true)

    start = int(bback_ignore)
    num = counts[0, start:]
    den = counts[1, start:]
    return jnp.mean((num + 1.0) / (den + 1.0) * 100.0)


def _centercrop(image, w, h):
    nt, ct, ht, wt = image.shape
    padw, padh = (wt - w) // 2, (ht - h) // 2
    if padw > 0 and padh > 0:
        image = image[:, :, padh:-padh, padw:-padw]
    return image


def _accuracy_ref(y_pred, y_true, bback_ignore=True):
    # Pure-JAX reference mirroring the PyTorch code, for a sanity check.
    n, ch, h, w = y_pred.shape
    y_true = _centercrop(y_true, w, h)
    prob = jax.nn.softmax(y_pred, axis=1)
    prediction = jnp.argmax(prob, axis=1)
    accs = []
    for c in range(int(bback_ignore), ch):
        yt_c = y_true[:, c, ...]
        num = jnp.sum(((prediction == c) & (yt_c == 1)).astype(jnp.float32)) + 1.0
        den = jnp.sum((yt_c == 1).astype(jnp.float32)) + 1.0
        accs.append(num / den * 100.0)
    return jnp.stack(accs).mean()


if __name__ == "__main__":
    key = jax.random.PRNGKey(0)
    k1, k2 = jax.random.split(key)

    N, C, H, W = 2, 4, 16, 16
    Ht, Wt = 20, 20  # y_true is larger -> exercises the in-kernel centercrop

    y_pred = jax.random.normal(k1, (N, C, H, W), dtype=jnp.float32)
    labels = jax.random.randint(k2, (N, Ht, Wt), 0, C)
    y_true = jax.nn.one_hot(labels, C, axis=1, dtype=jnp.float32)  # (N, C, Ht, Wt)

    out = accuracy(y_pred, y_true, bback_ignore=True)
    out = jax.block_until_ready(out)

    ref = _accuracy_ref(y_pred, y_true, bback_ignore=True)
    assert jnp.allclose(out, ref, rtol=1e-5, atol=1e-5), (out, ref)

    print("KERNEL_OK")
</pallas_src>

<mosaic_0001>
module attributes {stable_mosaic.version = 11 : i64} {
  func.func @_accuracy_counts_kernel(%arg0: i32, %arg1: memref<1x4x16x16xf32, #tpu.memory_space<vmem>>, %arg2: memref<1x4x20x20xf32, #tpu.memory_space<vmem>>, %arg3: memref<2x4xf32, #tpu.memory_space<vmem>>) attributes {dimension_semantics = [#tpu.dimension_semantics<arbitrary>], iteration_bounds = array<i64: 2>, scalar_prefetch = 0 : i64, scratch_operands = 0 : i64, tpu.core_type = #tpu.core_type<tc>, window_params = [{transform_indices = @transform_0, window_bounds = array<i64: 1, 4, 16, 16>}, {transform_indices = @transform_1, window_bounds = array<i64: 1, 4, 20, 20>}, {pipeline_mode = #tpu.pipeline_mode<synchronous>, transform_indices = @transform_2, window_bounds = array<i64: 2, 4>}]} {
    %c0_i32 = arith.constant 0 : i32
    %0 = arith.cmpi eq, %arg0, %c0_i32 : i32
    %1 = arith.extui %0 : i1 to i32
    %c0_i32_0 = arith.constant 0 : i32
    %2 = arith.cmpi ne, %1, %c0_i32_0 : i32
    scf.if %2 {
      %cst_48 = arith.constant 0.000000e+00 : f32
      %92 = vector.broadcast %cst_48 : f32 to vector<2x4xf32>
      %c0_49 = arith.constant 0 : index
      %c0_50 = arith.constant 0 : index
      %93 = vector.load %arg3[%c0_49, %c0_50] : memref<2x4xf32, #tpu.memory_space<vmem>>, vector<2x4xf32>
      tpu.vector_store %arg3[%c0_49, %c0_50], %92 {strides = array<i32>} : memref<2x4xf32, #tpu.memory_space<vmem>>, vector<2x4xf32>,
    } else {
    }
    %c0 = arith.constant 0 : index
    %c0_1 = arith.constant 0 : index
    %c0_2 = arith.constant 0 : index
    %c0_3 = arith.constant 0 : index
    %3 = vector.load %arg1[%c0, %c0_1, %c0_2, %c0_3] : memref<1x4x16x16xf32, #tpu.memory_space<vmem>>, vector<1x1x16x16xf32>
    %4 = vector.shape_cast %3 : vector<1x1x16x16xf32> to vector<16x16xf32>
    %c0_4 = arith.constant 0 : index
    %c1 = arith.constant 1 : index
    %c0_5 = arith.constant 0 : index
    %c0_6 = arith.constant 0 : index
    %5 = vector.load %arg1[%c0_4, %c1, %c0_5, %c0_6] : memref<1x4x16x16xf32, #tpu.memory_space<vmem>>, vector<1x1x16x16xf32>
    %6 = vector.shape_cast %5 : vector<1x1x16x16xf32> to vector<16x16xf32>
    %c0_7 = arith.constant 0 : index
    %c2 = arith.constant 2 : index
    %c0_8 = arith.constant 0 : index
    %c0_9 = arith.constant 0 : index
    %7 = vector.load %arg1[%c0_7, %c2, %c0_8, %c0_9] : memref<1x4x16x16xf32, #tpu.memory_space<vmem>>, vector<1x1x16x16xf32>
    %8 = vector.shape_cast %7 : vector<1x1x16x16xf32> to vector<16x16xf32>
    %c0_10 = arith.constant 0 : index
    %c3 = arith.constant 3 : index
    %c0_11 = arith.constant 0 : index
    %c0_12 = arith.constant 0 : index
    %9 = vector.load %arg1[%c0_10, %c3, %c0_11, %c0_12] : memref<1x4x16x16xf32, #tpu.memory_space<vmem>>, vector<1x1x16x16xf32>
    %10 = vector.shape_cast %9 : vector<1x1x16x16xf32> to vector<16x16xf32>
    %c0_13 = arith.constant 0 : index
    %c0_14 = arith.constant 0 : index
    %c2_15 = arith.constant 2 : index
    %c2_16 = arith.constant 2 : index
    %11 = vector.load %arg2[%c0_13, %c0_14, %c2_15, %c2_16] : memref<1x4x20x20xf32, #tpu.memory_space<vmem>>, vector<1x1x16x16xf32>
    %12 = vector.shape_cast %11 : vector<1x1x16x16xf32> to vector<16x16xf32>
    %c0_17 = arith.constant 0 : index
    %c1_18 = arith.constant 1 : index
    %c2_19 = arith.constant 2 : index
    %c2_20 = arith.constant 2 : index
    %13 = vector.load %arg2[%c0_17, %c1_18, %c2_19, %c2_20] : memref<1x4x20x20xf32, #tpu.memory_space<vmem>>, vector<1x1x16x16xf32>
    %14 = vector.shape_cast %13 : vector<1x1x16x16xf32> to vector<16x16xf32>
    %c0_21 = arith.constant 0 : index
    %c2_22 = arith.constant 2 : index
    %c2_23 = arith.constant 2 : index
    %c2_24 = arith.constant 2 : index
    %15 = vector.load %arg2[%c0_21, %c2_22, %c2_23, %c2_24] : memref<1x4x20x20xf32, #tpu.memory_space<vmem>>, vector<1x1x16x16xf32>
    %16 = vector.shape_cast %15 : vector<1x1x16x16xf32> to vector<16x16xf32>
    %c0_25 = arith.constant 0 : index
    %c3_26 = arith.constant 3 : index
    %c2_27 = arith.constant 2 : index
    %c2_28 = arith.constant 2 : index
    %17 = vector.load %arg2[%c0_25, %c3_26, %c2_27, %c2_28] : memref<1x4x20x20xf32, #tpu.memory_space<vmem>>, vector<1x1x16x16xf32>
    %18 = vector.shape_cast %17 : vector<1x1x16x16xf32> to vector<16x16xf32>
    %19 = arith.maximumf %4, %6 : vector<16x16xf32>
    %20 = arith.maximumf %19, %8 : vector<16x16xf32>
    %21 = arith.maximumf %20, %10 : vector<16x16xf32>
    %false = arith.constant false
    %22 = vector.broadcast %false : i1 to vector<16x16xi1>
    %23 = arith.cmpf oeq, %4, %21 : vector<16x16xf32>
    %cst = arith.constant dense<true> : vector<16x16xi1>
    %24 = arith.xori %22, %cst : vector<16x16xi1>
    %25 = arith.andi %23, %24 : vector<16x16xi1>
    %26 = arith.ori %22, %23 : vector<16x16xi1>
    %cst_29 = arith.constant 1.000000e+00 : f32
    %27 = vector.broadcast %cst_29 : f32 to vector<16x16xf32>
    %28 = arith.cmpf oeq, %12, %27 : vector<16x16xf32>
    %29 = arith.andi %25, %28 : vector<16x16xi1>
    %30 = arith.extui %29 : vector<16x16xi1> to vector<16x16xi32>
    %31 = arith.sitofp %30 : vector<16x16xi32> to vector<16x16xf32>
    %32 = arith.extui %28 : vector<16x16xi1> to vector<16x16xi32>
    %33 = arith.sitofp %32 : vector<16x16xi32> to vector<16x16xf32>
    %34 = arith.cmpf oeq, %6, %21 : vector<16x16xf32>
    %cst_30 = arith.constant dense<true> : vector<16x16xi1>
    %35 = arith.xori %26, %cst_30 : vector<16x16xi1>
    %36 = arith.andi %34, %35 : vector<16x16xi1>
    %37 = arith.ori %26, %34 : vector<16x16xi1>
    %cst_31 = arith.constant 1.000000e+00 : f32
    %38 = vector.broadcast %cst_31 : f32 to vector<16x16xf32>
    %39 = arith.cmpf oeq, %14, %38 : vector<16x16xf32>
    %40 = arith.andi %36, %39 : vector<16x16xi1>
    %41 = arith.extui %40 : vector<16x16xi1> to vector<16x16xi32>
    %42 = arith.sitofp %41 : vector<16x16xi32> to vector<16x16xf32>
    %43 = arith.extui %39 : vector<16x16xi1> to vector<16x16xi32>
    %44 = arith.sitofp %43 : vector<16x16xi32> to vector<16x16xf32>
    %45 = arith.cmpf oeq, %8, %21 : vector<16x16xf32>
    %cst_32 = arith.constant dense<true> : vector<16x16xi1>
    %46 = arith.xori %37, %cst_32 : vector<16x16xi1>
    %47 = arith.andi %45, %46 : vector<16x16xi1>
    %48 = arith.ori %37, %45 : vector<16x16xi1>
    %cst_33 = arith.constant 1.000000e+00 : f32
    %49 = vector.broadcast %cst_33 : f32 to vector<16x16xf32>
    %50 = arith.cmpf oeq, %16, %49 : vector<16x16xf32>
    %51 = arith.andi %47, %50 : vector<16x16xi1>
    %52 = arith.extui %51 : vector<16x16xi1> to vector<16x16xi32>
    %53 = arith.sitofp %52 : vector<16x16xi32> to vector<16x16xf32>
    %54 = arith.extui %50 : vector<16x16xi1> to vector<16x16xi32>
    %55 = arith.sitofp %54 : vector<16x16xi32> to vector<16x16xf32>
    %56 = arith.cmpf oeq, %10, %21 : vector<16x16xf32>
    %cst_34 = arith.constant dense<true> : vector<16x16xi1>
    %57 = arith.xori %48, %cst_34 : vector<16x16xi1>
    %58 = arith.andi %56, %57 : vector<16x16xi1>
    %cst_35 = arith.constant 1.000000e+00 : f32
    %59 = vector.broadcast %cst_35 : f32 to vector<16x16xf32>
    %60 = arith.cmpf oeq, %18, %59 : vector<16x16xf32>
    %61 = arith.andi %58, %60 : vector<16x16xi1>
    %62 = arith.extui %61 : vector<16x16xi1> to vector<16x16xi32>
    %63 = arith.sitofp %62 : vector<16x16xi32> to vector<16x16xf32>
    %64 = arith.extui %60 : vector<16x16xi1> to vector<16x16xi32>
    %65 = arith.sitofp %64 : vector<16x16xi32> to vector<16x16xf32>
    %66 = vector.shape_cast %31 : vector<16x16xf32> to vector<1x16x16xf32>
    %67 = vector.shape_cast %42 : vector<16x16xf32> to vector<1x16x16xf32>
    %68 = vector.shape_cast %53 : vector<16x16xf32> to vector<1x16x16xf32>
    %69 = vector.shape_cast %63 : vector<16x16xf32> to vector<1x16x16xf32>
    %70 = tpu.concatenate %66, %67, %68, %69 in 0 : vector<1x16x16xf32>, vector<1x16x16xf32>, vector<1x16x16xf32>, vector<1x16x16xf32> -> vector<4x16x16xf32>
    %71 = vector.shape_cast %33 : vector<16x16xf32> to vector<1x16x16xf32>
    %72 = vector.shape_cast %44 : vector<16x16xf32> to vector<1x16x16xf32>
    %73 = vector.shape_cast %55 : vector<16x16xf32> to vector<1x16x16xf32>
    %74 = vector.shape_cast %65 : vector<16x16xf32> to vector<1x16x16xf32>
    %75 = tpu.concatenate %71, %72, %73, %74 in 0 : vector<1x16x16xf32>, vector<1x16x16xf32>, vector<1x16x16xf32>, vector<1x16x16xf32> -> vector<4x16x16xf32>
    %cst_36 = arith.constant dense<0.000000e+00> : vector<4x16xf32>
    %76 = vector.multi_reduction <add>, %70, %cst_36 [2] : vector<4x16x16xf32> to vector<4x16xf32>
    %cst_37 = arith.constant dense<0.000000e+00> : vector<4xf32>
    %77 = vector.multi_reduction <add>, %76, %cst_37 [1] : vector<4x16xf32> to vector<4xf32>
    %cst_38 = arith.constant dense<0.000000e+00> : vector<4x16xf32>
    %78 = vector.multi_reduction <add>, %75, %cst_38 [2] : vector<4x16x16xf32> to vector<4x16xf32>
    %cst_39 = arith.constant dense<0.000000e+00> : vector<4xf32>
    %79 = vector.multi_reduction <add>, %78, %cst_39 [1] : vector<4x16xf32> to vector<4xf32>
    %c0_40 = arith.constant 0 : index
    %c0_41 = arith.constant 0 : index
    %80 = vector.load %arg3[%c0_40, %c0_41] : memref<2x4xf32, #tpu.memory_space<vmem>>, vector<1x4xf32>
    %81 = vector.shape_cast %80 : vector<1x4xf32> to vector<4xf32>
    %82 = arith.addf %81, %77 : vector<4xf32>
    %c0_42 = arith.constant 0 : index
    %c0_43 = arith.constant 0 : index
    %83 = vector.load %arg3[%c0_42, %c0_43] : memref<2x4xf32, #tpu.memory_space<vmem>>, vector<1x4xf32>
    %84 = vector.shape_cast %83 : vector<1x4xf32> to vector<4xf32>
    %85 = vector.shape_cast %82 : vector<4xf32> to vector<1x4xf32>
    tpu.vector_store %arg3[%c0_42, %c0_43], %85 {strides = array<i32>} : memref<2x4xf32, #tpu.memory_space<vmem>>, vector<1x4xf32>,
    %c1_44 = arith.constant 1 : index
    %c0_45 = arith.constant 0 : index
    %86 = vector.load %arg3[%c1_44, %c0_45] : memref<2x4xf32, #tpu.memory_space<vmem>>, vector<1x4xf32>
    %87 = vector.shape_cast %86 : vector<1x4xf32> to vector<4xf32>
    %88 = arith.addf %87, %79 : vector<4xf32>
    %c1_46 = arith.constant 1 : index
    %c0_47 = arith.constant 0 : index
    %89 = vector.load %arg3[%c1_46, %c0_47] : memref<2x4xf32, #tpu.memory_space<vmem>>, vector<1x4xf32>
    %90 = vector.shape_cast %89 : vector<1x4xf32> to vector<4xf32>
    %91 = vector.shape_cast %88 : vector<4xf32> to vector<1x4xf32>
    tpu.vector_store %arg3[%c1_46, %c0_47], %91 {strides = array<i32>} : memref<2x4xf32, #tpu.memory_space<vmem>>, vector<1x4xf32>,
    return
  }
  func.func @transform_0(%arg0: i32) -> (i32, i32, i32, i32) {
    %c0_i32 = arith.constant 0 : i32
    %c0_i32_0 = arith.constant 0 : i32
    %c0_i32_1 = arith.constant 0 : i32
    %c0_i32_2 = arith.constant 0 : i32
    return %arg0, %c0_i32, %c0_i32_0, %c0_i32_1 : i32, i32, i32, i32
  }
  func.func @transform_1(%arg0: i32) -> (i32, i32, i32, i32) {
    %c0_i32 = arith.constant 0 : i32
    %c0_i32_0 = arith.constant 0 : i32
    %c0_i32_1 = arith.constant 0 : i32
    %c0_i32_2 = arith.constant 0 : i32
    return %arg0, %c0_i32, %c0_i32_0, %c0_i32_1 : i32, i32, i32, i32
  }
  func.func @transform_2(%arg0: i32) -> (i32, i32) {
    %c0_i32 = arith.constant 0 : i32
    %c0_i32_0 = arith.constant 0 : i32
    %c0_i32_1 = arith.constant 0 : i32
    return %c0_i32, %c0_i32_0 : i32, i32
  }
}

</mosaic_0001>

<bundles_post_ra>
// kernel: accuracy.1
= control target key start
LH: loop header
LB: loop body
LE: loop exit
PB: predicated region body
PF: predicated region fallthrough
CT: control target
= control target key end

     0   :  { %s576_s9 = smov 0   ;;  %s772_s0 = inlined_call_operand.vmem [shape: f32[2,4,16,16], index: 0, kind: input, shape index: {}]   ;;  %s773_s1 = inlined_call_operand.vmem [shape: f32[2,4,20,20], index: 1, kind: input, shape index: {}]   ;;  %s774_s2 = inlined_call_operand.vmem [shape: f32[2,4], index: 2, kind: output, shape index: {}]  }
   0x1 LB: > { %s475_s10 = sadd.s32 4294967295, %s554_s9   ;;  %p478_p0 = scmp.ge.s32.totalorder %s554_s9, 1  ;;  %s554_s9 = sphi %s576_s9, %s12_s9  }
   0x2   : > { %p117_p1 = scmp.lt.s32.totalorder %s554_s9, 3 }
   0x4   : > { %p118_p2 = pnand %p478_p0, %p117_p1 }
   0x5   : > { %p139_p3 = scmp.lt.s32.totalorder (!%p118_p2), %s475_s10, 1  ;;  %p482_p4 = scmp.ne.s32.totalorder (!%p118_p2), %s475_s10, 0 }
   0x6   : > { %121 = sbr.rel (%p118_p2) target bundleno = 447 (0x1bf), region = 28 }
   0xb   : > { %s140_s11 = scalar_select %p139_p3, %s475_s10, 1 }
   0xc   : > { %152 = sbr.rel (%p482_p4) target bundleno = 19 (0x13), region = 32 }
   0xd   : > { %s513_s12 = sshll.u32 %s140_s11, 6  ;;  %s514_s13 = smul.u32 96, %s140_s11 }
   0xe   : > { %s587_s16 = scalar_lea.vmem %s772_s0, %s513_s12 }
   0xf   : > { %s148_s19 = scalar_lea.vmem %s773_s1, %s514_s13 }
  0x11   : > { %vm153_vm0 = vcmask 25600   ;;  %v556_v0 = vmov 0.0  }
  0x12   : > { %154 = vst.msk [vmem:[%s774_s2] sm:$0x3] %vm153_vm0, %v556_v0 }
  0x13 PF: > { %v489_v1 = vld [vmem:[%s148_s19 + $0x1a] sm:$0xff]  ;;  %v166_v2 = vld [vmem:[%s148_s19 + $0x2] sm:$0xff]  ;;  %v557_v3 = vmov 0   ;;  %v167_v7 = vld [vmem:[%s148_s19 + $0xa] sm:$0xff]  ;;  %s558_s22 = smov 126   ;;  %v559_v18 = vmov 0.0  }
  0x14   : > { %vm211_vm1 = vcmp.eq.f32.partialorder %v489_v1, 1.0  ;;  %vm185_vm2 = vcmp.eq.f32.partialorder %v166_v2, 1.0  ;;  %v490_v6 = vld [vmem:[%s148_s19 + $0x22] sm:$0xff]  ;;  %v491_v8 = vld [vmem:[%s148_s19 + $0x32] sm:$0xff]  ;;  %vm186_vm4 = vcmp.eq.f32.partialorder %v167_v7, 1.0  ;;  %v492_v12 = vld [vmem:[%s148_s19 + $0x3a] sm:$0xff] }
  0x15   : > { %v213_v4 = vsel %vm211_vm1, 1, %v557_v3  ;;  %v187_v5 = vsel %vm185_vm2, 1, %v557_v3  ;;  %vm212_vm3 = vcmp.eq.f32.partialorder %v490_v6, 1.0  ;;  %vm237_vm5 = vcmp.eq.f32.partialorder %v491_v8, 1.0  ;;  %v494_v13 = vld [vmem:[%s148_s19 + $0x52] sm:$0xff]  ;;  %v493_v14 = vld [vmem:[%s148_s19 + $0x4a] sm:$0xff] }
  0x16   : > { %215 = vrot.lane.b32.xlu1 %v213_v4, %s558_s22  ;;  %189 = vrot.lane.b32.xlu0 %v187_v5, %s558_s22  ;;  %v239_v9 = vsel %vm237_vm5, 1, %v557_v3  ;;  %v214_v10 = vsel %vm212_vm3, 1, %v557_v3  ;;  %v188_v11 = vsel %vm186_vm4, 1, %v557_v3  ;;  %vm238_vm6 = vcmp.eq.f32.partialorder %v492_v12, 1.0  ;;  %v155_v40 = vld [vmem:[%s587_s16] sm:$0xff]  ;;  %v483_v41 = vld [vmem:[%s587_s16 + $0x10] sm:$0xff] }
  0x17   : > { %241 = vrot.lane.b32.xlu2 %v239_v9, %s558_s22  ;;  %vm262_vm7 = vcmp.eq.f32.partialorder %v494_v13, 1.0  ;;  %vm261_vm8 = vcmp.eq.f32.partialorder %v493_v14, 1.0  ;;  %v240_v15 = vsel %vm238_vm6, 1, %v557_v3  ;;  %v497_v19 = vsel %vm185_vm2, 1.0, %v559_v18  ;;  %v156_v45 = vld [vmem:[%s587_s16 + $0x8] sm:$0xff]  ;;  %v484_v46 = vld [vmem:[%s587_s16 + $0x18] sm:$0xff] }
  0x18   : > { %v264_v16 = vsel %vm262_vm7, 1, %v557_v3  ;;  %v263_v17 = vsel %vm261_vm8, 1, %v557_v3  ;;  %v498_v20 = vsel %vm186_vm4, 1.0, %v559_v18  ;;  %v501_v21 = vsel %vm211_vm1, 1.0, %v559_v18  ;;  %v642_v47 = vld [vmem:[%s587_s16 + $0x20] sm:$0xff]  ;;  %v646_v50 = vld [vmem:[%s587_s16 + $0x28] sm:$0xff] }
  0x19   : > { %v502_v22 = vsel %vm212_vm3, 1.0, %v559_v18  ;;  %v505_v23 = vsel %vm237_vm5, 1.0, %v559_v18  ;;  %v506_v24 = vsel %vm238_vm6, 1.0, %v559_v18  ;;  %v528_v25 = vpack.i.bf16 %v498_v20, %v497_v19  ;;  %v649_v51 = vld [vmem:[%s587_s16 + $0x30] sm:$0xff]  ;;  %v488_v56 = vld [vmem:[%s587_s16 + $0x38] sm:$0xff] }
  0x1a   : > { %v538_v26 = vpack.i.bf16 %v506_v24, %v505_v23  ;;  %v533_v27 = vpack.i.bf16 %v502_v22, %v501_v21  ;;  %v510_v28 = vsel %vm262_vm7, 1.0, %v559_v18  ;;  %v509_v29 = vsel %vm261_vm8, 1.0, %v559_v18 }
  0x1b   : > { %v543_v30 = vpack.i.bf16 %v510_v28, %v509_v29  ;;  %vm778_vm9 = vcmask 130048   ;;  %v177_v44 = vmax.f32 %v155_v40, %v483_v41  ;;  %v178_v48 = vmax.f32 %v156_v45, %v484_v46 }
  0x1c   : > { %vm776_vm12 = vmmov 1  }
  0x1d   : > { %v179_v49 = vmax.f32 %v177_v44, %v642_v47  ;;  %v180_v54 = vmax.f32 %v178_v48, %v646_v50 }
  0x1e   : > { %217 = vrot.lane.b32.xlu1 %v214_v10, %s558_s22  ;;  %191 = vrot.lane.b32.xlu0 %v188_v11, %s558_s22 }
  0x1f   : > { %243 = vrot.lane.b32.xlu2 %v240_v15, %s558_s22  ;;  %v657_v55 = vmax.f32 %v179_v49, %v649_v51  ;;  %v182_v57 = vmax.f32 %v180_v54, %v488_v56 }
  0x21   : > { %vm203_vm10 = vcmp.eq.f32.partialorder %v483_v41, %v657_v55  ;;  %vm183_vm11 = vcmp.eq.f32.partialorder %v155_v40, %v657_v55  ;;  %vm184_vm15 = vcmp.eq.f32.partialorder %v156_v45, %v182_v57  ;;  %vm775_vm5 = vcmp.eq.f32.partialorder %v642_v47, %v657_v55 }
  0x22   : > { %vm205_vm13 = vmxor %vm183_vm11, %vm776_vm12  ;;  %vm204_vm7 = vcmp.eq.f32.partialorder %v484_v46, %v182_v57 }
  0x23   : > { %vm667_vm14 = vmor %vm183_vm11, %vm203_vm10 }
  0x24   : > { %vm207_vm1 = vmand %vm203_vm10, %vm205_vm13 }
  0x25   : > { %vm231_vm3 = vmxor %vm667_vm14, %vm776_vm12 }
  0x26   : > { %267 = vrot.lane.b32.xlu1 %v264_v16, %s558_s22  ;;  %265 = vrot.lane.b32.xlu0 %v263_v17, %s558_s22  ;;  %vm233_vm8 = vmand %vm775_vm5, %vm231_vm3  ;;  %vm230_vm3 = vcmp.eq.f32.partialorder %v646_v50, %v182_v57 }
  0x27   : > { %529 = vrot.lane.b32.xlu2 %v528_v25, %s558_s22  ;;  %vm206_vm13 = vmxor %vm184_vm15, %vm776_vm12 }
  0x28   : > { %vm208_vm5 = vmand %vm204_vm7, %vm206_vm13 }
  0x2e   : > { %539 = vrot.lane.b32.xlu1 %v538_v26, %s558_s22  ;;  %534 = vrot.lane.b32.xlu0 %v533_v27, %s558_s22 }
  0x2f   : > { %544 = vrot.lane.b32.xlu2 %v543_v30, %s558_s22 }
  0x71   : > { %v629_v31 = vpop.permute.xlu2 %241 }
  0x72   : > { %vm245_vm10 = vcmp.ne.s32.totalorder %v629_v31, 0 }
  0x79   : > { %v631_v32 = vpop.permute.xlu2 %243 }
  0x81   : > { %v530_v33 = vpop.permute.xlu2 %529 }
  0x82   : > { %v532_v34 = vunpack.i.h.bf16 %v530_v33  ;;  %v531_v35 = vunpack.i.l.bf16 %v530_v33 }
  0x84   : > { %v374_v38 = vsel %vm778_vm9, %v532_v34, 0.0  ;;  %v371_v39 = vsel %vm778_vm9, %v531_v35, 0.0 }
  0x85   : > { %375 = vadd.xlane.f32.xlu1 %v374_v38  ;;  %372 = vadd.xlane.f32.xlu0 %v371_v39 }
  0x88   : > { %v216_v36 = vpop.permute.xlu1 %215  ;;  %v633_v37 = vpop.permute.xlu0 %189 }
  0x89   : > { %vm219_vm2 = vcmp.ne.s32.totalorder %v216_v36, 0  ;;  %v545_v14 = vpop.permute.xlu2 %544 }
  0x8a   : > { %vm221_vm6 = vmand %vm207_vm1, %vm219_vm2  ;;  %vm193_vm2 = vcmp.ne.s32.totalorder %v633_v37, 0  ;;  %v546_v19 = vunpack.i.l.bf16 %v545_v14  ;;  %v547_v27 = vunpack.i.h.bf16 %v545_v14  ;;  %v312_v37 = vlaneseq }
  0x8b   : > { %v499_v7 = vsel %vm221_vm6, 1.0, %v559_v18  ;;  %vm694_vm1 = vmand %vm233_vm8, %vm245_vm10  ;;  %vm256_vm8 = vcmp.eq.f32.partialorder %v488_v56, %v182_v57  ;;  %vm785_vm10 = vmmov 1  }
  0x8c   : > { %v286_v10 = vsel %vm778_vm9, %v499_v7, 0.0  ;;  %v503_v11 = vsel %vm694_vm1, 1.0, %v559_v18  ;;  %vm788_vm1 = vcmp.eq.f32.partialorder %v642_v47, %v657_v55  ;;  %v313_v40 = vand.u32 127, %v312_v37 }
  0x8e   : > { %v315_v41 = vadd.s32 4294967288, %v313_v40 }
  0x90   : > { %v218_v42 = vpop.permute.xlu1 %217  ;;  %v192_v43 = vpop.permute.xlu0 %191 }
  0x91   : > { %vm194_vm0 = vcmp.ne.s32.totalorder %v192_v43, 0  ;;  %vm220_vm12 = vcmp.ne.s32.totalorder %v218_v42, 0 }
  0x92   : > { %vm196_vm4 = vmand %vm184_vm15, %vm194_vm0 }
  0x93   : > { %v496_v4 = vsel %vm196_vm4, 1.0, %v559_v18  ;;  %vm688_vm0 = vmor %vm184_vm15, %vm204_vm7 }
  0x94   : > { %v283_v9 = vsel %vm778_vm9, %v496_v4, 0.0  ;;  %vm236_vm15 = vmor %vm688_vm0, %vm230_vm3 }
  0x95   : > { %vm195_vm4 = vmand %vm183_vm11, %vm193_vm2  ;;  %vm786_vm2 = vcmask 130048  }
  0x96   : > { %vm222_vm6 = vmand %vm208_vm5, %vm220_vm12  ;;  %v495_v12 = vsel %vm195_vm4, 1.0, %v559_v18  ;;  %vm246_vm5 = vcmp.ne.s32.totalorder %v631_v32, 0  ;;  %v292_v15 = vsel %vm786_vm2, %v503_v11, 0.0 }
  0x97   : > { %vm258_vm7 = vmxor %vm236_vm15, %vm785_vm10  ;;  %v500_v13 = vsel %vm222_vm6, 1.0, %v559_v18 }
  0x98   : > { %v651_v52 = vpop.permute.xlu1 %267  ;;  %v653_v53 = vpop.permute.xlu0 %265  ;;  %vm232_vm13 = vmxor %vm688_vm0, %vm785_vm10 }
  0x99   : > { %vm270_vm11 = vcmp.ne.s32.totalorder %v651_v52, 0  ;;  %vm234_vm12 = vmand %vm230_vm3, %vm232_vm13 }
  0x9a   : > { %vm787_vm0 = vmmov %vm786_vm2  ;;  %vm269_vm2 = vcmp.ne.s32.totalorder %v653_v53, 0 }
  0x9b   : > { %v280_v16 = vsel %vm787_vm0, %v495_v12, 0.0  ;;  %vm235_vm15 = vmor %vm667_vm14, %vm788_vm1  ;;  %vm328_vm1 = vcmask 1041409  }
  0x9c   : > { %vm789_vm4 = vmmov %vm787_vm0 }
  0x9d   : > { %v289_v17 = vsel %vm789_vm4, %v500_v13, 0.0  ;;  %vm248_vm3 = vmand %vm234_vm12, %vm246_vm5  ;;  %vm317_vm5 = vcmask 130112   ;;  %vm330_vm4 = vcmask 1042434  }
  0x9e   : > { %v504_v21 = vsel %vm248_vm3, 1.0, %v559_v18  ;;  %vm790_vm13 = vmmov %vm787_vm0  ;;  %vm427_vm3 = vcmask 24576  }
  0x9f   : > { %v389_v22 = vsel %vm790_vm13, %v546_v19, 0.0  ;;  %vm793_vm12 = vmmov %vm787_vm0 }
  0xa0   : > { %v540_v58 = vpop.permute.xlu1 %539  ;;  %v535_v59 = vpop.permute.xlu0 %534  ;;  %v392_v28 = vsel %vm793_vm12, %v547_v27, 0.0 }
  0xa1   : > { %v542_v61 = vunpack.i.h.bf16 %v540_v58  ;;  %v537_v62 = vunpack.i.h.bf16 %v535_v59  ;;  %v536_v63 = vunpack.i.l.bf16 %v535_v59  ;;  %v541_v3 = vunpack.i.l.bf16 %v540_v58 }
  0xa3   : > { %v386_v0 = vsel %vm778_vm9, %v542_v61, 0.0  ;;  %v380_v1 = vsel %vm778_vm9, %v537_v62, 0.0  ;;  %v377_v2 = vsel %vm778_vm9, %v536_v63, 0.0  ;;  %v383_v6 = vsel %vm778_vm9, %v541_v3, 0.0  ;;  %vm260_vm9 = vmand %vm256_vm8, %vm258_vm7 }
  0xa4   : > { %387 = vadd.xlane.f32.xlu1 %v386_v0  ;;  %381 = vadd.xlane.f32.xlu0 %v380_v1  ;;  %vm272_vm6 = vmand %vm260_vm9, %vm270_vm11  ;;  %vm255_vm8 = vcmp.eq.f32.partialorder %v649_v51, %v657_v55 }
  0xa5   : > { %378 = vadd.xlane.f32.xlu2 %v377_v2  ;;  %vm257_vm7 = vmxor %vm235_vm15, %vm785_vm10  ;;  %v508_v20 = vsel %vm272_vm6, 1.0, %v559_v18  ;;  %vm332_vm15 = vcmask 1043459   ;;  %vm335_vm6 = vcmask 125952  }
  0xa6   : > { %vm259_vm14 = vmand %vm255_vm8, %vm257_vm7  ;;  %v301_v23 = vsel %vm787_vm0, %v508_v20, 0.0  ;;  %v429_v20 = vld [vmem:[%s774_s2 + $0x1] sm:$0x1] }
  0xa7   : > { %vm791_vm9 = vmmov %vm787_vm0 }
  0xa8   : > { %v295_v24 = vsel %vm791_vm9, %v504_v21, 0.0  ;;  %vm271_vm11 = vmand %vm259_vm14, %vm269_vm2 }
  0xa9   : > { %v507_v25 = vsel %vm271_vm11, 1.0, %v559_v18  ;;  %vm792_vm10 = vmmov %vm787_vm0 }
  0xaa   : > { %v298_v26 = vsel %vm792_vm10, %v507_v25, 0.0 }
  0xac   : > { %384 = vadd.xlane.f32.xlu0 %v383_v6  ;;  %284 = vadd.xlane.f32.xlu1 %v283_v9 }
  0xad   : > { %287 = vadd.xlane.f32.xlu2 %v286_v10 }
  0xb4   : > { %293 = vadd.xlane.f32.xlu1 %v292_v15  ;;  %281 = vadd.xlane.f32.xlu0 %v280_v16  ;;  %v422_v15 = vld [vmem:[%s774_s2] sm:$0x1] }
  0xb5   : > { %290 = vadd.xlane.f32.xlu2 %v289_v17 }
  0xbc   : > { %302 = vadd.xlane.f32.xlu0 %v301_v23  ;;  %390 = vadd.xlane.f32.xlu1 %v389_v22 }
  0xbd   : > { %296 = vadd.xlane.f32.xlu2 %v295_v24 }
  0xc5   : > { %299 = vadd.xlane.f32.xlu2 %v298_v26 }
  0xcd   : > { %393 = vadd.xlane.f32.xlu2 %v392_v28 }
  0xf8   : > { %v373_v29 = vpop.xlane.xlu0 %372  ;;  %v376_v30 = vpop.xlane.xlu1 %375 }
  0xf9   : > { %v404_v54 = vperm.slane %v376_v30, %v315_v41  ;;  %v403_v57 = vperm.slane %v373_v29, %v313_v40 }
  0xfb   : > { %v405_v4 = vsel %vm317_vm5, %v404_v54, %v403_v57 }
 0x117   : > { %v382_v31 = vpop.xlane.xlu0 %381  ;;  %v388_v33 = vpop.xlane.xlu1 %387 }
 0x118   : > { %v379_v32 = vpop.xlane.xlu2 %378  ;;  %v407_v59 = vperm.slane %v382_v31, %v315_v41  ;;  %v410_v63 = vperm.slane %v388_v33, %v315_v41 }
 0x119   : > { %v406_v60 = vperm.slane %v379_v32, %v313_v40 }
 0x11b   : > { %v408_v5 = vsel %vm317_vm5, %v407_v59, %v406_v60 }
 0x11c   : > { %v415_v10 = vsel %vm328_vm1, %v408_v5, %v405_v4 }
 0x11f   : > { %v385_v35 = vpop.xlane.xlu0 %384  ;;  %v285_v38 = vpop.xlane.xlu1 %284 }
 0x120   : > { %v288_v34 = vpop.xlane.xlu2 %287  ;;  %v316_v46 = vperm.slane %v285_v38, %v315_v41  ;;  %v409_v0 = vperm.slane %v385_v35, %v313_v40 }
 0x121   : > { %v319_v47 = vperm.slane %v288_v34, %v313_v40 }
 0x122   : > { %v411_v7 = vsel %vm317_vm5, %v410_v63, %v409_v0 }
 0x123   : > { %v416_v12 = vsel %vm330_vm4, %v411_v7, %v415_v10 }
 0x127   : > { %v282_v39 = vpop.xlane.xlu0 %281  ;;  %v294_v42 = vpop.xlane.xlu1 %293 }
 0x128   : > { %v291_v36 = vpop.xlane.xlu2 %290  ;;  %v314_v44 = vperm.slane %v282_v39, %v313_v40  ;;  %v322_v48 = vperm.slane %v294_v42, %v313_v40 }
 0x129   : > { %v320_v43 = vperm.slane %v291_v36, %v315_v41 }
 0x12a   : > { %v318_v51 = vsel %vm317_vm5, %v316_v46, %v314_v44 }
 0x12b   : > { %v321_v50 = vsel %vm317_vm5, %v320_v43, %v319_v47 }
 0x12c   : > { %v329_v58 = vsel %vm328_vm1, %v321_v50, %v318_v51 }
 0x12f   : > { %v303_v49 = vpop.xlane.xlu0 %302  ;;  %v391_v2 = vpop.xlane.xlu1 %390 }
 0x130   : > { %v297_v18 = vpop.xlane.xlu2 %296  ;;  %v326_v55 = vperm.slane %v303_v49, %v315_v41  ;;  %v412_v6 = vperm.slane %v391_v2, %v313_v40 }
 0x131   : > { %v323_v45 = vperm.slane %v297_v18, %v315_v41 }
 0x133   : > { %v324_v52 = vsel %vm317_vm5, %v323_v45, %v322_v48 }
 0x134   : > { %v331_v62 = vsel %vm330_vm4, %v324_v52, %v329_v58 }
 0x138   : > { %v300_v53 = vpop.xlane.xlu2 %299 }
 0x139   : > { %v325_v56 = vperm.slane %v300_v53, %v313_v40 }
 0x13b   : > { %v327_v61 = vsel %vm317_vm5, %v326_v55, %v325_v56 }
 0x13c   : > { %v333_v1 = vsel %vm332_vm15, %v327_v61, %v331_v62 }
 0x13d   : > { %v336_v3 = vsel %vm335_vm6, %v333_v1, 0.0 }
 0x13e   : > { %337 = vadd.xlane.f32.xlu0 %v336_v3 }
 0x140   : > { %v394_v8 = vpop.xlane.xlu2 %393 }
 0x141   : > { %v413_v9 = vperm.slane %v394_v8, %v315_v41 }
 0x143   : > { %v414_v11 = vsel %vm317_vm5, %v413_v9, %v412_v6 }
 0x144   : > { %v417_v13 = vsel %vm332_vm15, %v414_v11, %v416_v12 }
 0x145   : > { %v419_v14 = vsel %vm335_vm6, %v417_v13, 0.0 }
 0x146   : > { %420 = vadd.xlane.f32.xlu1 %v419_v14 }
 0x1b1   : > { %v338_v16 = vpop.xlane.xlu0 %337 }
 0x1b2   : > { %v424_v17 = vperm.slane %v338_v16, %v313_v40 }
 0x1b4   : > { %v426_v19 = vadd.f32 %v424_v17, %v422_v15 }
 0x1b6   : > { %428 = vst.msk [vmem:[%s774_s2] sm:$0x1] %vm427_vm3, %v426_v19 }
 0x1b9   : > { %v421_v21 = vpop.xlane.xlu1 %420 }
 0x1ba   : > { %v431_v22 = vperm.slane %v421_v21, %v313_v40 }
 0x1bc   : > { %v433_v23 = vadd.f32 %v431_v22, %v429_v20 }
 0x1be   : > { %434 = vst.msk [vmem:[%s774_s2 + $0x1] sm:$0x1] %vm427_vm3, %v433_v23 }
 0x1bf PF: > { %s12_s9 = sadd.s32 1, %s554_s9  }
 0x1c0   : > { %p9_p5 = scmp.ge.s32.totalorder %s12_s9, 4  }
 0x1c2   :  { %11 = sbr.rel (!%p9_p5) target bundleno = 1 (0x1), region = 67 }

</bundles_post_ra>
